<compile_context>
chip_gen: v7x
topology: tpu7x:2x2x1
jax: 0.10.0
libtpu: 0.0.40
codegen_flags: <defaults>
</compile_context>

<pallas_src>
import functools

import jax
import jax.numpy as jnp
from jax.experimental import pallas as pl
from jax.experimental.pallas import tpu as pltpu

_EPS = 1e-8  # F.cosine_similarity default eps


def _homo_loss_kernel(thrd_ref, xs_ref, xd_ref, w_ref, psum_ref, pcnt_ref,
                      sum_sc, cnt_sc):
    # Grid = (num_splits, edge_tiles_per_split); axis 1 is the reduction axis.
    i = pl.program_id(1)

    @pl.when(i == 0)
    def _():
        sum_sc[...] = jnp.zeros_like(sum_sc)
        cnt_sc[...] = jnp.zeros_like(cnt_sc)

    xs = xs_ref[...].astype(jnp.float32)          # (TE, D)
    xd = xd_ref[...].astype(jnp.float32)          # (TE, D)
    w = w_ref[...]                                # (TE, 1) f32

    dot = jnp.sum(xs * xd, axis=1, keepdims=True)   # (TE, 1)
    ss = jnp.sum(xs * xs, axis=1, keepdims=True)    # (TE, 1)
    dd = jnp.sum(xd * xd, axis=1, keepdims=True)    # (TE, 1)
    # sqrt(a) * sqrt(b) == sqrt(a*b): one EUP sqrt instead of two.
    norm = jnp.sqrt(ss * dd)
    cos = dot / jnp.maximum(norm, _EPS)

    thrd = thrd_ref[0]                               # scalar from SMEM
    mask = (w > 0.0).astype(jnp.float32)             # edge filter (padded edges -> 0)
    vals = jnp.maximum(thrd - cos, 0.0) * mask       # relu(thrd - cos), masked

    sum_sc[...] += jnp.sum(vals, axis=(0, 1), keepdims=True)
    cnt_sc[...] += jnp.sum(mask, axis=(0, 1), keepdims=True)

    @pl.when(i == pl.num_programs(1) - 1)
    def _():
        psum_ref[...] = sum_sc[...]
        pcnt_ref[...] = cnt_sc[...]


def _round_up(a, b):
    return ((a + b - 1) // b) * b


@functools.partial(jax.jit, static_argnames=("tile_e", "num_splits"))
def homo_loss(trigger_edge_index, trigger_edge_weights, x, thrd,
              tile_e=None, num_splits=2):
    E = trigger_edge_index.shape[1]
    D = x.shape[1]

    if tile_e is None:
        # ~2 MiB per (tile_e, D) input block in x's native dtype; double-buffered
        # x 2 inputs (+ lane-padded weights) stays ~13 MiB, comfortably inside the
        # smallest per-generation VMEM budget (v7x: 64 MiB physical).
        itemsize = jnp.dtype(x.dtype).itemsize
        tile_e = (2 * 1024 * 1024) // max(D * itemsize, 1)
        tile_e = min(4096, tile_e)
    tile_e = max(8, (tile_e // 8) * 8)
    # Don't over-pad tiny edge lists.
    tile_e = min(tile_e, _round_up(pl.cdiv(E, num_splits), 8))

    e_pad = _round_up(E, tile_e * num_splits)
    pad = e_pad - E

    # Pad the SMALL index/weight arrays before the gather (cheap). Padded edges
    # gather real row 0 but carry weight 0, so they are masked out; the eps clamp
    # keeps them finite even if row 0 were all zeros.
    src = jnp.pad(trigger_edge_index[0], (0, pad))
    dst = jnp.pad(trigger_edge_index[1], (0, pad))
    w = jnp.pad(trigger_edge_weights.astype(jnp.float32), (0, pad)).reshape(e_pad, 1)

    # Gather endpoint features in x's native dtype (no wrapper-side f32 upcast:
    # bf16 inputs stream half the HBM bytes; cast to f32 happens in VMEM).
    xs = x[src]   # (e_pad, D)
    xd = x[dst]   # (e_pad, D)

    thrd_arr = jnp.asarray([thrd], dtype=jnp.float32)

    tiles_per_split = e_pad // (tile_e * num_splits)
    grid = (num_splits, tiles_per_split)

    edge_idx = lambda c, i: (c * tiles_per_split + i, 0)

    psum, pcnt = pl.pallas_call(
        _homo_loss_kernel,
        out_shape=(
            jax.ShapeDtypeStruct((num_splits, 1, 1), jnp.float32),  # per-split sum
            jax.ShapeDtypeStruct((num_splits, 1, 1), jnp.float32),  # per-split count
        ),
        grid_spec=pltpu.PrefetchScalarGridSpec(
            num_scalar_prefetch=0,
            grid=grid,
            in_specs=[
                pl.BlockSpec(memory_space=pltpu.SMEM),            # thrd scalar
                pl.BlockSpec((tile_e, D), edge_idx),              # x_src tile
                pl.BlockSpec((tile_e, D), edge_idx),              # x_dst tile
                pl.BlockSpec((tile_e, 1), edge_idx),              # edge weights tile
            ],
            out_specs=[
                pl.BlockSpec((None, 1, 1), lambda c, i: (c, 0, 0)),
                pl.BlockSpec((None, 1, 1), lambda c, i: (c, 0, 0)),
            ],
            scratch_shapes=[
                pltpu.VMEM((1, 1), jnp.float32),                  # running sum
                pltpu.VMEM((1, 1), jnp.float32),                  # running count
            ],
        ),
        compiler_params=pltpu.CompilerParams(
            dimension_semantics=("parallel", "arbitrary"),
            vmem_limit_bytes=48 * 1024 * 1024,
        ),
    )(thrd_arr, xs, xd, w)

    # Combine per-split partials. NaN if no edge has weight > 0 (matches torch
    # mean over an empty tensor).
    return jnp.sum(psum) / jnp.sum(pcnt)


def _homo_loss_ref(trigger_edge_index, trigger_edge_weights, x, thrd):
    # Pure-JAX reference (same masked-mean formulation, PyTorch-style two-sqrt norm).
    xs = x[trigger_edge_index[0]].astype(jnp.float32)
    xd = x[trigger_edge_index[1]].astype(jnp.float32)
    dot = jnp.sum(xs * xd, axis=1)
    n_s = jnp.sqrt(jnp.sum(xs * xs, axis=1))
    n_d = jnp.sqrt(jnp.sum(xd * xd, axis=1))
    cos = dot / jnp.maximum(n_s * n_d, _EPS)
    mask = (trigger_edge_weights > 0.0).astype(jnp.float32)
    vals = jnp.maximum(thrd - cos, 0.0)
    return jnp.sum(vals * mask) / jnp.sum(mask)


if __name__ == "__main__":
    key = jax.random.PRNGKey(0)
    k_x, k_src, k_dst, k_w = jax.random.split(key, 4)

    # Case 1: small graph, auto tile size.
    num_nodes, feat_dim, num_edges = 16, 32, 12
    x = jax.random.normal(k_x, (num_nodes, feat_dim), dtype=jnp.float32)
    src = jax.random.randint(k_src, (num_edges,), 0, num_nodes)
    dst = jax.random.randint(k_dst, (num_edges,), 0, num_nodes)
    trigger_edge_index = jnp.stack([src, dst], axis=0)          # (2, E)
    # Weights in [-0.5, 0.5] so some edges are filtered out (weight <= 0).
    trigger_edge_weights = jax.random.uniform(k_w, (num_edges,), minval=-0.5, maxval=0.5)
    thrd = 0.5

    loss = homo_loss(trigger_edge_index, trigger_edge_weights, x, thrd)
    jax.block_until_ready(loss)
    ref = _homo_loss_ref(trigger_edge_index, trigger_edge_weights, x, thrd)
    assert jnp.allclose(loss, ref, rtol=1e-5, atol=1e-6), (loss, ref)

    # Case 2: more edges with a forced small tile to exercise the multi-step
    # accumulation path (2 splits x several edge tiles each).
    k_x2, k_s2, k_d2, k_w2 = jax.random.split(jax.random.PRNGKey(0), 4)
    num_nodes2, feat_dim2, num_edges2 = 32, 32, 40
    x2 = jax.random.normal(k_x2, (num_nodes2, feat_dim2), dtype=jnp.float32)
    src2 = jax.random.randint(k_s2, (num_edges2,), 0, num_nodes2)
    dst2 = jax.random.randint(k_d2, (num_edges2,), 0, num_nodes2)
    tei2 = jnp.stack([src2, dst2], axis=0)
    tew2 = jax.random.uniform(k_w2, (num_edges2,), minval=-0.5, maxval=0.5)

    loss2 = homo_loss(tei2, tew2, x2, 0.3, tile_e=8)
    jax.block_until_ready(loss2)
    ref2 = _homo_loss_ref(tei2, tew2, x2, 0.3)
    assert jnp.allclose(loss2, ref2, rtol=1e-5, atol=1e-6), (loss2, ref2)

    print("KERNEL_OK")
</pallas_src>

<mosaic_0001>
module attributes {stable_mosaic.version = 11 : i64} {
  func.func @_homo_loss_kernel(%arg0: i32, %arg1: i32, %arg2: memref<1xf32, #tpu.memory_space<smem>>, %arg3: memref<8x32xf32, #tpu.memory_space<vmem>>, %arg4: memref<8x32xf32, #tpu.memory_space<vmem>>, %arg5: memref<8x1xf32, #tpu.memory_space<vmem>>, %arg6: memref<1x1x1xf32, #tpu.memory_space<vmem>>, %arg7: memref<1x1x1xf32, #tpu.memory_space<vmem>>, %arg8: memref<1x1xf32, #tpu.memory_space<vmem>>, %arg9: memref<1x1xf32, #tpu.memory_space<vmem>>) attributes {dimension_semantics = [#tpu.dimension_semantics<parallel>, #tpu.dimension_semantics<arbitrary>], iteration_bounds = array<i64: 2, 1>, scalar_prefetch = 0 : i64, scratch_operands = 2 : i64, tpu.core_type = #tpu.core_type<tc>, window_params = [{transform_indices = @transform_0, window_bounds = array<i64: 1>}, {transform_indices = @transform_1, window_bounds = array<i64: 8, 32>}, {transform_indices = @transform_2, window_bounds = array<i64: 8, 32>}, {transform_indices = @transform_3, window_bounds = array<i64: 8, 1>}, {transform_indices = @transform_4, window_bounds = array<i64: 1, 1, 1>}, {transform_indices = @transform_5, window_bounds = array<i64: 1, 1, 1>}]} {
    %c0_i32 = arith.constant 0 : i32
    %0 = arith.cmpi eq, %arg1, %c0_i32 : i32
    %1 = arith.extui %0 : i1 to i32
    %c0_i32_0 = arith.constant 0 : i32
    %2 = arith.cmpi ne, %1, %c0_i32_0 : i32
    scf.if %2 {
      %cst_24 = arith.constant 0.000000e+00 : f32
      %49 = vector.broadcast %cst_24 : f32 to vector<1x1xf32>
      %c0_25 = arith.constant 0 : index
      %c0_26 = arith.constant 0 : index
      %50 = vector.load %arg8[%c0_25, %c0_26] : memref<1x1xf32, #tpu.memory_space<vmem>>, vector<1x1xf32>
      tpu.vector_store %arg8[%c0_25, %c0_26], %49 {strides = array<i32>} : memref<1x1xf32, #tpu.memory_space<vmem>>, vector<1x1xf32>,
      %cst_27 = arith.constant 0.000000e+00 : f32
      %51 = vector.broadcast %cst_27 : f32 to vector<1x1xf32>
      %c0_28 = arith.constant 0 : index
      %c0_29 = arith.constant 0 : index
      %52 = vector.load %arg9[%c0_28, %c0_29] : memref<1x1xf32, #tpu.memory_space<vmem>>, vector<1x1xf32>
      tpu.vector_store %arg9[%c0_28, %c0_29], %51 {strides = array<i32>} : memref<1x1xf32, #tpu.memory_space<vmem>>, vector<1x1xf32>,
    } else {
    }
    %c0 = arith.constant 0 : index
    %c0_1 = arith.constant 0 : index
    %3 = vector.load %arg3[%c0, %c0_1] : memref<8x32xf32, #tpu.memory_space<vmem>>, vector<8x32xf32>
    %c0_2 = arith.constant 0 : index
    %c0_3 = arith.constant 0 : index
    %4 = vector.load %arg4[%c0_2, %c0_3] : memref<8x32xf32, #tpu.memory_space<vmem>>, vector<8x32xf32>
    %c0_4 = arith.constant 0 : index
    %c0_5 = arith.constant 0 : index
    %5 = vector.load %arg5[%c0_4, %c0_5] : memref<8x1xf32, #tpu.memory_space<vmem>>, vector<8x1xf32>
    %6 = arith.mulf %3, %4 : vector<8x32xf32>
    %cst = arith.constant dense<0.000000e+00> : vector<8xf32>
    %7 = vector.multi_reduction <add>, %6, %cst [1] : vector<8x32xf32> to vector<8xf32>
    %8 = vector.shape_cast %7 : vector<8xf32> to vector<8x1xf32>
    %9 = arith.mulf %3, %3 : vector<8x32xf32>
    %cst_6 = arith.constant dense<0.000000e+00> : vector<8xf32>
    %10 = vector.multi_reduction <add>, %9, %cst_6 [1] : vector<8x32xf32> to vector<8xf32>
    %11 = vector.shape_cast %10 : vector<8xf32> to vector<8x1xf32>
    %12 = arith.mulf %4, %4 : vector<8x32xf32>
    %cst_7 = arith.constant dense<0.000000e+00> : vector<8xf32>
    %13 = vector.multi_reduction <add>, %12, %cst_7 [1] : vector<8x32xf32> to vector<8xf32>
    %14 = vector.shape_cast %13 : vector<8xf32> to vector<8x1xf32>
    %15 = arith.mulf %11, %14 : vector<8x1xf32>
    %16 = math.sqrt %15 : vector<8x1xf32>
    %cst_8 = arith.constant 9.99999993E-9 : f32
    %17 = vector.broadcast %cst_8 : f32 to vector<8x1xf32>
    %18 = arith.maximumf %16, %17 : vector<8x1xf32>
    %19 = arith.divf %8, %18 : vector<8x1xf32>
    %c0_9 = arith.constant 0 : index
    %20 = memref.load %arg2[%c0_9] : memref<1xf32, #tpu.memory_space<smem>>
    %cst_10 = arith.constant 0.000000e+00 : f32
    %21 = vector.broadcast %cst_10 : f32 to vector<8x1xf32>
    %22 = arith.cmpf ogt, %5, %21 : vector<8x1xf32>
    %23 = arith.extui %22 : vector<8x1xi1> to vector<8x1xi32>
    %24 = arith.sitofp %23 : vector<8x1xi32> to vector<8x1xf32>
    %25 = vector.broadcast %20 : f32 to vector<8x1xf32>
    %26 = arith.subf %25, %19 : vector<8x1xf32>
    %cst_11 = arith.constant 0.000000e+00 : f32
    %27 = vector.broadcast %cst_11 : f32 to vector<8x1xf32>
    %28 = arith.maximumf %26, %27 : vector<8x1xf32>
    %29 = arith.mulf %28, %24 : vector<8x1xf32>
    %c0_12 = arith.constant 0 : index
    %c0_13 = arith.constant 0 : index
    %30 = vector.load %arg8[%c0_12, %c0_13] : memref<1x1xf32, #tpu.memory_space<vmem>>, vector<1x1xf32>
    %31 = vector.shape_cast %29 : vector<8x1xf32> to vector<1x8x1xf32>
    %cst_14 = arith.constant dense<0.000000e+00> : vector<1xf32>
    %32 = vector.multi_reduction <add>, %31, %cst_14 [1, 2] : vector<1x8x1xf32> to vector<1xf32>
    %33 = vector.shape_cast %32 : vector<1xf32> to vector<1x1x1xf32>
    %34 = vector.extract %33[0, 0, 0] : f32 from vector<1x1x1xf32>
    %35 = vector.broadcast %34 : f32 to vector<1x1xf32>
    %36 = arith.addf %30, %35 : vector<1x1xf32>
    %c0_15 = arith.constant 0 : index
    %c0_16 = arith.constant 0 : index
    %37 = vector.load %arg8[%c0_15, %c0_16] : memref<1x1xf32, #tpu.memory_space<vmem>>, vector<1x1xf32>
    tpu.vector_store %arg8[%c0_15, %c0_16], %36 {strides = array<i32>} : memref<1x1xf32, #tpu.memory_space<vmem>>, vector<1x1xf32>,
    %c0_17 = arith.constant 0 : index
    %c0_18 = arith.constant 0 : index
    %38 = vector.load %arg9[%c0_17, %c0_18] : memref<1x1xf32, #tpu.memory_space<vmem>>, vector<1x1xf32>
    %39 = vector.shape_cast %24 : vector<8x1xf32> to vector<1x8x1xf32>
    %cst_19 = arith.constant dense<0.000000e+00> : vector<1xf32>
    %40 = vector.multi_reduction <add>, %39, %cst_19 [1, 2] : vector<1x8x1xf32> to vector<1xf32>
    %41 = vector.shape_cast %40 : vector<1xf32> to vector<1x1x1xf32>
    %42 = vector.extract %41[0, 0, 0] : f32 from vector<1x1x1xf32>
    %43 = vector.broadcast %42 : f32 to vector<1x1xf32>
    %44 = arith.addf %38, %43 : vector<1x1xf32>
    %c0_20 = arith.constant 0 : index
    %c0_21 = arith.constant 0 : index
    %45 = vector.load %arg9[%c0_20, %c0_21] : memref<1x1xf32, #tpu.memory_space<vmem>>, vector<1x1xf32>
    tpu.vector_store %arg9[%c0_20, %c0_21], %44 {strides = array<i32>} : memref<1x1xf32, #tpu.memory_space<vmem>>, vector<1x1xf32>,
    %c0_i32_22 = arith.constant 0 : i32
    %46 = arith.cmpi eq, %arg1, %c0_i32_22 : i32
    %47 = arith.extui %46 : i1 to i32
    %c0_i32_23 = arith.constant 0 : i32
    %48 = arith.cmpi ne, %47, %c0_i32_23 : i32
    scf.if %48 {
      %c0_24 = arith.constant 0 : index
      %c0_25 = arith.constant 0 : index
      %49 = vector.load %arg8[%c0_24, %c0_25] : memref<1x1xf32, #tpu.memory_space<vmem>>, vector<1x1xf32>
      %c0_26 = arith.constant 0 : index
      %c0_27 = arith.constant 0 : index
      %c0_28 = arith.constant 0 : index
      %50 = vector.load %arg6[%c0_26, %c0_27, %c0_28] : memref<1x1x1xf32, #tpu.memory_space<vmem>>, vector<1x1x1xf32>
      %51 = vector.shape_cast %50 : vector<1x1x1xf32> to vector<1x1xf32>
      %52 = vector.shape_cast %49 : vector<1x1xf32> to vector<1x1x1xf32>
      tpu.vector_store %arg6[%c0_26, %c0_27, %c0_28], %52 {strides = array<i32>} : memref<1x1x1xf32, #tpu.memory_space<vmem>>, vector<1x1x1xf32>,
      %c0_29 = arith.constant 0 : index
      %c0_30 = arith.constant 0 : index
      %53 = vector.load %arg9[%c0_29, %c0_30] : memref<1x1xf32, #tpu.memory_space<vmem>>, vector<1x1xf32>
      %c0_31 = arith.constant 0 : index
      %c0_32 = arith.constant 0 : index
      %c0_33 = arith.constant 0 : index
      %54 = vector.load %arg7[%c0_31, %c0_32, %c0_33] : memref<1x1x1xf32, #tpu.memory_space<vmem>>, vector<1x1x1xf32>
      %55 = vector.shape_cast %54 : vector<1x1x1xf32> to vector<1x1xf32>
      %56 = vector.shape_cast %53 : vector<1x1xf32> to vector<1x1x1xf32>
      tpu.vector_store %arg7[%c0_31, %c0_32, %c0_33], %56 {strides = array<i32>} : memref<1x1x1xf32, #tpu.memory_space<vmem>>, vector<1x1x1xf32>,
    } else {
    }
    return
  }
  func.func @transform_0(%arg0: i32, %arg1: i32) -> i32 {
    %c0_i32 = arith.constant 0 : i32
    %c0_i32_0 = arith.constant 0 : i32
    return %c0_i32 : i32
  }
  func.func @transform_1(%arg0: i32, %arg1: i32) -> (i32, i32) {
    %c1_i32 = arith.constant 1 : i32
    %0 = arith.muli %arg0, %c1_i32 : i32
    %1 = arith.addi %0, %arg1 : i32
    %c0_i32 = arith.constant 0 : i32
    %c0_i32_0 = arith.constant 0 : i32
    return %1, %c0_i32 : i32, i32
  }
  func.func @transform_2(%arg0: i32, %arg1: i32) -> (i32, i32) {
    %c1_i32 = arith.constant 1 : i32
    %0 = arith.muli %arg0, %c1_i32 : i32
    %1 = arith.addi %0, %arg1 : i32
    %c0_i32 = arith.constant 0 : i32
    %c0_i32_0 = arith.constant 0 : i32
    return %1, %c0_i32 : i32, i32
  }
  func.func @transform_3(%arg0: i32, %arg1: i32) -> (i32, i32) {
    %c1_i32 = arith.constant 1 : i32
    %0 = arith.muli %arg0, %c1_i32 : i32
    %1 = arith.addi %0, %arg1 : i32
    %c0_i32 = arith.constant 0 : i32
    %c0_i32_0 = arith.constant 0 : i32
    return %1, %c0_i32 : i32, i32
  }
  func.func @transform_4(%arg0: i32, %arg1: i32) -> (i32, i32, i32) {
    %c0_i32 = arith.constant 0 : i32
    %c0_i32_0 = arith.constant 0 : i32
    %c0_i32_1 = arith.constant 0 : i32
    return %arg0, %c0_i32, %c0_i32_0 : i32, i32, i32
  }
  func.func @transform_5(%arg0: i32, %arg1: i32) -> (i32, i32, i32) {
    %c0_i32 = arith.constant 0 : i32
    %c0_i32_0 = arith.constant 0 : i32
    %c0_i32_1 = arith.constant 0 : i32
    return %arg0, %c0_i32, %c0_i32_0 : i32, i32, i32
  }
}

</mosaic_0001>

<bundles_post_ra>
// kernel: homo_loss.1
= control target key start
LH: loop header
LB: loop body
LE: loop exit
PB: predicated region body
PF: predicated region fallthrough
CT: control target
= control target key end

     0   :  { %s580_s20 = smov 0   ;;  %s582_s21 = smov 0   ;;  %s635_s0 = inlined_call_operand.<no memory space> [shape: f32[1], index: 0, kind: input, shape index: {}]   ;;  %s636_s1 = inlined_call_operand.vmem [shape: f32[16,32], index: 1, kind: input, shape index: {}]   ;;  %s637_s2 = inlined_call_operand.vmem [shape: f32[16,32], index: 2, kind: input, shape index: {}]   ;;  %s638_s3 = inlined_call_operand.vmem [shape: f32[16,1], index: 3, kind: input, shape index: {}]   ;;  %s639_s4 = inlined_call_operand.vmem [shape: f32[2,1,1], index: 4, kind: output, shape index: {0}]   ;;  %s640_s5 = inlined_call_operand.vmem [shape: f32[2,1,1], index: 5, kind: output, shape index: {1}]  }
   0x1   :  { %11 = sst [smem:[#allocation4]] %s635_s0  ;;  %s584_s22 = smov 0  }
   0x2 LB: > { %s29_s0 = sadd.s32 1, %s540_s21  ;;  %p482_p0 = scmp.ge.s32.totalorder %s544_s22, 1  ;;  %s544_s22 = sphi %s584_s22, %s17_s22   ;;  %s540_s21 = sphi %s582_s21, %s642_s21   ;;  %s536_s20 = sphi %s580_s20, %s641_s20  }
   0x3   : > { %p31_p1 = scmp.ge.s32.totalorder %s29_s0, 2  ;;  %p232_p2 = scmp.lt.s32.totalorder %s544_s22, 3 }
   0x5   : > { %s644_s0 = smov (%p31_p1, %s29_s0), 0  ;;  %p233_p3 = pnand %p482_p0, %p232_p2 }
   0x6   : > { %p272_p4 = scmp.lt.s32.totalorder (!%p233_p3), %s536_s20, 1  ;;  %vm306_vm0 = vcmask (!%p233_p3), 261120   ;;  %v546_v9 = vmov (!%p233_p3), 0.0   ;;  %vm338_vm2 = vcmask (!%p233_p3), 7168   ;;  %vm299_vm3 = vcmask (!%p233_p3), 0   ;;  %s329_s8 = sld [smem:[#allocation4]] (!%p233_p3) }
   0x7   : > { %236 = sbr.rel (%p233_p3) target bundleno = 423 (0x1a7), region = 36  ;;  %300 = vst.msk [vmem:[#allocation2] sm:$0x1] (!%p233_p3), %vm299_vm3, %v546_v9  ;;  %301 = vst.msk [vmem:[#allocation3] sm:$0x1] (!%p233_p3), %vm299_vm3, %v546_v9 }
   0xc   : > { %v333_v23 = vstv (!%p233_p3), %s329_s8 }
   0xe   : > { %s646_s20 = smov (!%p272_p4, %s536_s20), 1  ;;  %v337_v43 = vld [vmem:[#allocation2] sm:$0x1]  ;;  %v353_v44 = vld [vmem:[#allocation3] sm:$0x1] }
   0xf   : > { %s483_s23 = sshll.u32 %s646_s20, 3  ;;  %s291_s13 = scalar_lea.vmem %s639_s4, %s646_s20 }
  0x10   : > { %s275_s26 = scalar_lea.vmem %s636_s1, %s483_s23  ;;  %s281_s29 = scalar_lea.vmem %s637_s2, %s483_s23 }
  0x11   : > { %v302_v0 = vld [vmem:[%s275_s26] sm:$0xff]  ;;  %s287_s7 = scalar_lea.vmem %s638_s3, %s483_s23  ;;  %s294_s16 = scalar_lea.vmem %s640_s5, %s646_s20 }
  0x12   : > { %v310_v1 = vmul.f32 %v302_v0, %v302_v0  ;;  %v303_v2 = vld [vmem:[%s281_s29] sm:$0xff] }
  0x13   : > { %v314_v3 = vmul.f32 %v303_v2, %v303_v2  ;;  %v305_v4 = vmul.f32 %v303_v2, %v302_v0  ;;  %v304_v8 = vld [vmem:[%s287_s7] sm:$0xff] }
  0x14   : > { %v311_v5 = vsel %vm306_vm0, %v310_v1, 0.0  ;;  %vm330_vm1 = vcmp.gt.f32.partialorder %v304_v8, 0.0 }
  0x15   : > { %312 = vadd.xlane.f32.xlu0 %v311_v5  ;;  %v307_v6 = vsel %vm306_vm0, %v305_v4, 0.0  ;;  %v315_v7 = vsel %vm306_vm0, %v314_v3, 0.0  ;;  %v486_v10 = vsel %vm330_vm1, 1.0, %v546_v9 }
  0x16   : > { %308 = vadd.xlane.f32.xlu1 %v307_v6  ;;  %v354_v11 = vsel %vm338_vm2, %v486_v10, 0.0 }
  0x19   : > { %316 = vadd.xlane.f32.xlu0 %v315_v7 }
  0x1d   : > { %355 = vadd.xlane.f32.xlu0 %v354_v11 }
  0xa2   : > { %v313_v12 = vpop.xlane.xlu0 %312 }
  0xa3   : > { %v309_v21 = vpop.xlane.xlu1 %308 }
  0xa6   : > { %v317_v13 = vpop.xlane.xlu0 %316 }
  0xa7   : > { %v318_v14 = vmul.f32 %v317_v13, %v313_v12 }
  0xa9   : > { %518 = vrsqrt.f32 %v318_v14  ;;  %vm321_vm4 = vcmp.eq.f32.partialorder %v318_v14, inf  ;;  %v324_v17 = vand.u32 2147483648, %v318_v14  ;;  %vm323_vm5 = vcmp.eq.f32.partialorder %v318_v14, 0.0 }
  0xaa   : > { %v356_v29 = vpop.xlane.xlu0 %355 }
  0xab   : > { %v357_v30 = vrot.slane %v356_v29, 4 }
  0xad   : > { %v358_v31 = vadd.f32 %v357_v30, %v356_v29 }
  0xaf   : > { %v359_v32 = vrot.slane %v358_v31, 2 }
  0xb1   : > { %v360_v36 = vadd.f32 %v359_v32, %v358_v31 }
  0xb3   : > { %v519_v15 = vpop.eup %518  ;;  %v361_v39 = vrot.slane %v360_v36, 1 }
  0xb4   : > { %v320_v16 = vmul.f32 %v519_v15, %v318_v14 }
  0xb5   : > { %v362_v42 = vadd.f32 %v361_v39, %v360_v36 }
  0xb6   : > { %v322_v18 = vsel %vm321_vm4, %v318_v14, %v320_v16 }
  0xb7   : > { %v325_v19 = vsel %vm323_vm5, %v324_v17, %v322_v18 }
  0xb8   : > { %v326_v20 = vmax.f32 %v325_v19, 1e-08 }
  0xba   : > { %520 = vrcp.f32 %v326_v20 }
  0xc4   : > { %v521_v22 = vpop.eup %520 }
  0xc5   : > { %v328_v24 = vmul.f32 %v521_v22, %v309_v21 }
  0xc7   : > { %v334_v25 = vsub.f32 %v333_v23, %v328_v24 }
  0xc9   : > { %v335_v26 = vmax.f32 %v334_v25, 0.0 }
  0xcb   : > { %v336_v27 = vmul.f32 %v486_v10, %v335_v26 }
  0xcd   : > { %v339_v28 = vsel %vm338_vm2, %v336_v27, 0.0 }
  0xce   : > { %340 = vadd.xlane.f32.xlu1 %v339_v28 }
 0x15b   : > { %v341_v33 = vpop.xlane.xlu1 %340 }
 0x15c   : > { %v342_v34 = vrot.slane %v341_v33, 4 }
 0x15e   : > { %v343_v35 = vadd.f32 %v342_v34, %v341_v33 }
 0x160   : > { %v344_v37 = vrot.slane %v343_v35, 2 }
 0x162   : > { %v345_v38 = vadd.f32 %v344_v37, %v343_v35 }
 0x164   : > { %v346_v40 = vrot.slane %v345_v38, 1 }
 0x166   : > { %v347_v41 = vadd.f32 %v346_v40, %v345_v38 }
 0x168   : > { %489 = vpush %v347_v41 }
 0x169   : > { %491 = vpush %v362_v42 }
 0x199   : > { %s490_s9 = spop %489 }
 0x19a   : > { %v349_v45 = vstv %s490_s9  ;;  %s492_s10 = spop %491 }
 0x19b   : > { %v350_v46 = vadd.f32 %v349_v45, %v337_v43  ;;  %v364_v47 = vstv %s492_s10 }
 0x19c   : > { %v365_v48 = vadd.f32 %v364_v47, %v353_v44 }
 0x19d   : > { %352 = vst.msk [vmem:[#allocation2] sm:$0x1] %vm299_vm3, %v350_v46 }
 0x19e   : > { %366 = vst.msk [vmem:[#allocation3] sm:$0x1] %vm299_vm3, %v365_v48 }
 0x1a4   : > { %v370_v49 = vld [vmem:[#allocation2] sm:$0x1] }
 0x1a5   : > { %371 = vst.msk [vmem:[%s291_s13] sm:$0x1] %vm299_vm3, %v370_v49  ;;  %v372_v50 = vld [vmem:[#allocation3] sm:$0x1] }
 0x1a6   : > { %373 = vst.msk [vmem:[%s294_s16] sm:$0x1] %vm299_vm3, %v372_v50 }
 0x1a7 PF: > { %s17_s22 = sadd.s32 1, %s544_s22   ;;  %s641_s20 = smov %s540_s21 }
 0x1a8   : > { %p14_p5 = scmp.ge.s32.totalorder %s17_s22, 4   ;;  %s642_s21 = smov %s644_s0 }
 0x1aa   :  { %16 = sbr.rel (!%p14_p5) target bundleno = 2 (0x2), region = 92 }

</bundles_post_ra>
